<compile_context>
chip_gen: v5e
topology: v5e:2x2
jax: 0.10.0
libtpu: 0.0.40
codegen_flags: <defaults>
</compile_context>

<pallas_src>
import functools

import jax
import jax.numpy as jnp
from jax.experimental import pallas as pl
from jax.experimental.pallas import tpu as pltpu


def _round_up(x: int, m: int) -> int:
    return (x + m - 1) // m * m


def _lm_head_kernel(x_ref, w_ref, b_ref, o_ref):
    # x_ref: (tm, H)  activation tile (re-streamed along the inner M axis)
    # w_ref: (H, tn)  pre-transposed weight tile (resident across inner M sweep)
    # b_ref: (1, tn)  bias tile (f32)
    # o_ref: (tm, tn) logits tile
    acc = jnp.dot(x_ref[...], w_ref[...], preferred_element_type=jnp.float32)
    o_ref[...] = (acc + b_ref[...].astype(jnp.float32)).astype(o_ref.dtype)


def prepare_lm_head_params(weight, bias, *, compute_dtype=jnp.bfloat16):
    """One-time (load-time) weight preparation.

    weight: (V, H) in PyTorch nn.Linear layout; bias: (V,).
    Returns (w_t, bias_row) with w_t: (H, V) in `compute_dtype`, bias_row: (1, V) f32.
    Do this ONCE when the checkpoint is loaded, not per forward call.
    """
    w_t = jnp.asarray(weight).T.astype(compute_dtype)          # (H, V)
    bias_row = jnp.asarray(bias).astype(jnp.float32).reshape(1, -1)
    return w_t, bias_row


@functools.partial(jax.jit, static_argnames=("tm", "tn", "out_dtype"))
def bert_generation_lm_head(hidden_states, w_t, bias_row, *, tm=None, tn=2048,
                            out_dtype=None):
    """logits = hidden_states @ weight.T + bias, with prepared params.

    hidden_states: (B, S, H); w_t: (H, V) pre-transposed/cast weight;
    bias_row: (1, V) f32.  Returns (B, S, V) logits in `out_dtype`
    (defaults to hidden_states.dtype).
    """
    B, S, H = hidden_states.shape
    Hw, V = w_t.shape
    assert Hw == H, f"hidden size mismatch: {H} vs {Hw}"
    M = B * S
    if out_dtype is None:
        out_dtype = hidden_states.dtype

    compute_dtype = w_t.dtype
    cbytes = jnp.dtype(compute_dtype).itemsize
    obytes = jnp.dtype(out_dtype).itemsize
    sub = 16 if cbytes == 2 else 8          # bf16 packs 2 rows / sublane

    # Tile sizing: lane-dense vocab tiles, sublane-aligned activation rows.
    if tm is None:
        tm = 512 if M >= 512 else 256       # fatter tiles for prefill-size M
    tm = _round_up(min(tm, _round_up(M, sub)), sub)
    tn = _round_up(min(tn, _round_up(V, 128)), 128)

    # Activations cast once here (M*H, tiny vs. the V*H weight stream).
    x = hidden_states.reshape(M, H).astype(compute_dtype)

    # Vocab OUTER (parallel / core-sharded), M inner (arbitrary): weight tile
    # index depends only on the outer axis -> streamed from HBM exactly once.
    grid = (pl.cdiv(V, tn), pl.cdiv(M, tm))

    # VMEM: double-buffered x + w + bias tiles and the output tile, + headroom.
    need = 2 * (tm * H * cbytes + H * tn * cbytes + tn * 4 + tm * tn * obytes)
    vmem_limit = min(96 * 1024 * 1024, max(48 * 1024 * 1024, need + (8 << 20)))

    cost = pl.CostEstimate(
        flops=2 * M * H * V,
        transcendentals=0,
        bytes_accessed=(x.size * cbytes + w_t.size * cbytes
                        + bias_row.size * 4 + M * V * obytes),
    )

    out = pl.pallas_call(
        _lm_head_kernel,
        out_shape=jax.ShapeDtypeStruct((M, V), out_dtype),
        grid_spec=pltpu.PrefetchScalarGridSpec(
            num_scalar_prefetch=0,
            grid=grid,
            in_specs=[
                # Activations: re-streamed along the inner M axis only.
                pl.BlockSpec((tm, H), lambda v, m: (m, 0)),
                # Weight: depends only on the outer vocab axis -> VMEM-resident
                # across the inner M sweep; contiguous-lane (H, tn) tile.
                pl.BlockSpec((H, tn), lambda v, m: (0, v)),
                # Bias: re-DMA'd only when the vocab tile changes.
                pl.BlockSpec((1, tn), lambda v, m: (0, v)),
            ],
            out_specs=pl.BlockSpec((tm, tn), lambda v, m: (m, v)),
        ),
        compiler_params=pltpu.CompilerParams(
            # Vocab axis is the sharded one: on v7x each TensorCore streams a
            # disjoint half of the weight instead of duplicating it.
            dimension_semantics=("parallel", "arbitrary"),
            vmem_limit_bytes=vmem_limit,
        ),
        cost_estimate=cost,
    )(x, w_t, bias_row)

    return out.reshape(B, S, V)


if __name__ == "__main__":
    # Small config consistent with the module: hidden_size=32, vocab_size=256.
    batch, seq, hidden_size, vocab_size = 2, 8, 32, 256

    key = jax.random.PRNGKey(0)
    k_x, k_w, k_b = jax.random.split(key, 3)

    hidden_states = jax.random.normal(k_x, (batch, seq, hidden_size), dtype=jnp.float32)
    # nn.Linear(hidden_size, vocab_size): weight (vocab_size, hidden_size), bias (vocab_size,)
    decoder_weight = jax.random.normal(k_w, (vocab_size, hidden_size), dtype=jnp.float32) * 0.02
    # Module initializes bias = zeros; perturb deterministically so the add is exercised.
    bias = jax.random.normal(k_b, (vocab_size,), dtype=jnp.float32) * 0.01

    ref = hidden_states @ decoder_weight.T + bias

    # 1) f32 compute path: exact semantics of the PyTorch module.
    w_f32, b_row = prepare_lm_head_params(decoder_weight, bias, compute_dtype=jnp.float32)
    logits = jax.block_until_ready(bert_generation_lm_head(hidden_states, w_f32, b_row))
    assert logits.shape == (batch, seq, vocab_size)
    assert logits.dtype == hidden_states.dtype
    assert jnp.allclose(logits, ref, atol=1e-4, rtol=1e-4)

    # 2) Default bf16 weight-streaming path (f32 accumulation, f32 output).
    w_bf16, b_row_bf = prepare_lm_head_params(decoder_weight, bias)
    logits_bf16 = jax.block_until_ready(
        bert_generation_lm_head(hidden_states, w_bf16, b_row_bf))
    assert logits_bf16.shape == (batch, seq, vocab_size)
    assert logits_bf16.dtype == hidden_states.dtype
    assert jnp.allclose(logits_bf16, ref, atol=2e-2, rtol=2e-2)

    # 3) Ragged shapes (masked boundary blocks, no padding / no output slice):
    #    M = 2*5 = 10 (not a multiple of 8/16), V = 200 (not a multiple of 128).
    hs2 = hidden_states[:, :5, :]
    w2, b2 = prepare_lm_head_params(decoder_weight[:200, :], bias[:200],
                                    compute_dtype=jnp.float32)
    logits2 = jax.block_until_ready(bert_generation_lm_head(hs2, w2, b2))
    ref2 = hs2 @ decoder_weight[:200, :].T + bias[:200]
    assert logits2.shape == (batch, 5, 200)
    assert jnp.allclose(logits2, ref2, atol=1e-4, rtol=1e-4)

    print("KERNEL_OK")
</pallas_src>

<mosaic_0001>
module attributes {stable_mosaic.version = 11 : i64} {
  func.func @_lm_head_kernel(%arg0: i32, %arg1: i32, %arg2: memref<16x32xf32, #tpu.memory_space<vmem>>, %arg3: memref<32x256xf32, #tpu.memory_space<vmem>>, %arg4: memref<1x256xf32, #tpu.memory_space<vmem>>, %arg5: memref<16x256xf32, #tpu.memory_space<vmem>>) attributes {dimension_semantics = [#tpu.dimension_semantics<parallel>, #tpu.dimension_semantics<arbitrary>], iteration_bounds = array<i64: 1, 1>, scalar_prefetch = 0 : i64, scratch_operands = 0 : i64, tpu.core_type = #tpu.core_type<tc>, window_params = [{transform_indices = @transform_0, window_bounds = array<i64: 16, 32>}, {transform_indices = @transform_1, window_bounds = array<i64: 32, 256>}, {transform_indices = @transform_2, window_bounds = array<i64: 1, 256>}, {transform_indices = @transform_3, window_bounds = array<i64: 16, 256>}]} {
    %c0 = arith.constant 0 : index
    %c0_0 = arith.constant 0 : index
    %0 = vector.load %arg2[%c0, %c0_0] : memref<16x32xf32, #tpu.memory_space<vmem>>, vector<16x32xf32>
    %c0_1 = arith.constant 0 : index
    %c0_2 = arith.constant 0 : index
    %1 = vector.load %arg3[%c0_1, %c0_2] : memref<32x256xf32, #tpu.memory_space<vmem>>, vector<32x256xf32>
    %cst = arith.constant dense<0.000000e+00> : vector<16x256xf32>
    %2 = tpu.matmul %0, %1, %cst {dimension_numbers = #tpu.dot_dimension_numbers<[1], [0], [0], [1], [0, 0, 1, 1], [], []>} : vector<16x32xf32>, vector<32x256xf32>, vector<16x256xf32> -> vector<16x256xf32>
    %c0_3 = arith.constant 0 : index
    %c0_4 = arith.constant 0 : index
    %3 = vector.load %arg4[%c0_3, %c0_4] : memref<1x256xf32, #tpu.memory_space<vmem>>, vector<1x256xf32>
    %4 = vector.broadcast %3 : vector<1x256xf32> to vector<16x256xf32>
    %5 = arith.addf %2, %4 : vector<16x256xf32>
    %c0_5 = arith.constant 0 : index
    %c0_6 = arith.constant 0 : index
    %6 = vector.load %arg5[%c0_5, %c0_6] : memref<16x256xf32, #tpu.memory_space<vmem>>, vector<16x256xf32>
    tpu.vector_store %arg5[%c0_5, %c0_6], %5 {strides = array<i32>} : memref<16x256xf32, #tpu.memory_space<vmem>>, vector<16x256xf32>,
    return
  }
  func.func @transform_0(%arg0: i32, %arg1: i32) -> (i32, i32) {
    %c0_i32 = arith.constant 0 : i32
    %c0_i32_0 = arith.constant 0 : i32
    return %arg1, %c0_i32 : i32, i32
  }
  func.func @transform_1(%arg0: i32, %arg1: i32) -> (i32, i32) {
    %c0_i32 = arith.constant 0 : i32
    %c0_i32_0 = arith.constant 0 : i32
    return %c0_i32, %arg0 : i32, i32
  }
  func.func @transform_2(%arg0: i32, %arg1: i32) -> (i32, i32) {
    %c0_i32 = arith.constant 0 : i32
    %c0_i32_0 = arith.constant 0 : i32
    return %c0_i32, %arg0 : i32, i32
  }
  func.func @transform_3(%arg0: i32, %arg1: i32) -> (i32, i32) {
    %c0_i32 = arith.constant 0 : i32
    return %arg1, %arg0 : i32, i32
  }
}

</mosaic_0001>

<bundles_post_ra>
// kernel: bert_generation_lm_head.1
= control target key start
LH: loop header
LB: loop body
LE: loop exit
PB: predicated region body
PF: predicated region fallthrough
CT: control target
= control target key end

     0   :  { %8 = vsyncpa [#allocation3], 0  ;;  %s282_s0 = inlined_call_operand.hbm [shape: f32[16,32], index: 0, kind: input, shape index: {}]   ;;  %s283_s1 = inlined_call_operand.hbm [shape: f32[32,256], index: 1, kind: input, shape index: {}]   ;;  %s284_s2 = inlined_call_operand.vmem [shape: f32[1,256], index: 2, kind: input, shape index: {}]   ;;  %s285_s3 = inlined_call_operand.hbm [shape: f32[16,256], index: 3, kind: output, shape index: {}]  }
   0x1   :  { %9 = vsyncpa [#allocation6], 0 }
   0x2   :  { %10 = vsyncpa [#allocation4], 0  ;;  %s15_s14 = sshll.u32 %s282_s0, 4  ;;  %s237_s15 = smov [#allocation2]   ;;  %s16_s14 = int_to_ptr.hbm [resolvable:$true] %s15_s14 }
   0x3   :  { %s17_s16 = sshll.u32 %s237_s15, 4  ;;  %s28_s19 = sshll.u32 %s283_s1, 4  ;;  %s18_s16 = int_to_ptr.vmem [resolvable:$true] %s17_s16  ;;  %s29_s19 = int_to_ptr.hbm [resolvable:$true] %s28_s19 }
   0x4   :  { %s238_s20 = smov 128   ;;  %s239_s21 = smov 8  }
   0x5   :  { %23 = dma.hbm_to_vmem [thread:$0]  %s16_s14, 256, %s18_s16, [#allocation3], %s238_s20, %s238_s20, %s239_s21  }
   0x6   :  { %s240_s22 = smov [#allocation5]   ;;  %s241_s24 = smov 256  }
   0x7   :  { %s30_s23 = sshll.u32 %s240_s22, 4  ;;  %s242_s25 = smov 16   ;;  %s31_s23 = int_to_ptr.vmem [resolvable:$true] %s30_s23 }
   0x8   :  { %36 = dma.hbm_to_vmem [thread:$0]  %s29_s19, 1024, %s31_s23, [#allocation6], %s241_s24, %s241_s24, %s242_s25  }
   0x9   :  { %231 = dma.done.wait [#allocation3], 256  }
   0xa   :  { %232 = vsyncadd [#allocation3], 4294967040 }
   0xb   :  { %233 = dma.done.wait [#allocation6], 1024  }
   0xc   :  { %234 = vsyncadd [#allocation6], 4294966272  ;;  %v55_v0 = vld [vmem:[#allocation5 + $0x30] sm:$0xff]  ;;  %v56_v1 = vld [vmem:[#allocation5 + $0x38] sm:$0xff]  ;;  %vm63_vm0 = vcmask 261120   ;;  %s243_s26 = smov [#allocation7]  }
   0xd   :  { %v53_v2 = vld [vmem:[#allocation5 + $0x20] sm:$0xff]  ;;  %144 = vmatpush.msra.mxu2 %v55_v0  ;;  %148 = vmatpush.msra.mxu3 %v56_v1  ;;  %v54_v3 = vld [vmem:[#allocation5 + $0x28] sm:$0xff]  ;;  %v51_v4 = vld [vmem:[#allocation5 + $0x10] sm:$0xff]  ;;  %s124_s27 = sshll.u32 %s243_s26, 4  ;;  %s126_s30 = sshll.u32 %s285_s3, 4  ;;  %s125_s27 = int_to_ptr.vmem [resolvable:$true] %s124_s27  ;;  %s127_s30 = int_to_ptr.hbm [resolvable:$true] %s126_s30 }
   0xe   :  { %v52_v5 = vld [vmem:[#allocation5 + $0x18] sm:$0xff]  ;;  %82 = vmatpush.msra.mxu0 %v55_v0  ;;  %105 = vmatpush.msra.mxu1 %v56_v1  ;;  %v49_v6 = vld [vmem:[#allocation5] sm:$0xff]  ;;  %v50_v7 = vld [vmem:[#allocation5 + $0x8] sm:$0xff] }
   0xf   :  { %145 = vmatpush.msra.mxu2 %v53_v2  ;;  %149 = vmatpush.msra.mxu3 %v54_v3  ;;  %v48_v8 = vld [vmem:[#allocation2 + $0x8] sm:$0xff]  ;;  %v47_v9 = vld [vmem:[#allocation2] sm:$0xff] }
  0x10   :  { %83 = vmatpush.msra.mxu0 %v53_v2  ;;  %106 = vmatpush.msra.mxu1 %v54_v3  ;;  %v57_v10 = vld [vmem:[%s284_s2] sm:$0x3] }
  0x11   :  { %146 = vmatpush.msra.mxu2 %v51_v4  ;;  %150 = vmatpush.msra.mxu3 %v52_v5  ;;  %v59_v11 = vperm.slane %v57_v10, 0  ;;  %v60_v12 = vperm.slane %v57_v10, 1 }
  0x12   :  { %84 = vmatpush.msra.mxu0 %v51_v4  ;;  %107 = vmatpush.msra.mxu1 %v52_v5 }
  0x13   :  { %147 = vmatpush.msra.mxu2 %v49_v6  ;;  %151 = vmatpush.msra.mxu3 %v50_v7 }
  0x14   :  { %141 = vmatmul.msk.f32.vlgmr.msra.gmra.mxu2 %vm63_vm0, %v48_v8  ;;  %143 = vmatmul.msk.f32.vlgmr.msra.gmra.mxu3 %vm63_vm0, %v48_v8 }
  0x15   :  { %85 = vmatpush.msra.mxu0 %v49_v6  ;;  %108 = vmatpush.msra.mxu1 %v50_v7 }
  0x16   :  { %140 = vmatmul.msk.f32.vlgmr.msra.gmra.mxu0 %vm63_vm0, %v47_v9  ;;  %142 = vmatmul.msk.f32.vlgmr.msra.gmra.mxu1 %vm63_vm0, %v47_v9 }
  0x93   :  { %v87_v13 = vpop.f32.mrf.mxu0  ;;  %v110_v14 = vpop.f32.mrf.mxu1 }
  0x94   :  { %v88_v15 = vadd.f32 %v87_v13, %v59_v11  ;;  %v111_v16 = vadd.f32 %v110_v14, %v60_v12 }
  0x96   :  { %116 = vst [vmem:[#allocation7] sm:$0xff] %v88_v15 }
  0x97   :  { %v90_v17 = vpop.f32.mrf.mxu2  ;;  %117 = vst [vmem:[#allocation7 + $0x8] sm:$0xff] %v111_v16  ;;  %v113_v18 = vpop.f32.mrf.mxu3 }
  0x98   :  { %v91_v19 = vadd.f32 %v90_v17, %v59_v11  ;;  %v114_v20 = vadd.f32 %v113_v18, %v60_v12 }
  0x9a   :  { %118 = vst [vmem:[#allocation7 + $0x10] sm:$0xff] %v91_v19 }
  0x9b   :  { %119 = vst [vmem:[#allocation7 + $0x18] sm:$0xff] %v114_v20 }
  0x9c   :  { %132 = dma.vmem_to_hbm [thread:$0]  %s125_s27, 512, %s127_s30, [#allocation4], %s241_s24, %s241_s24, %s242_s25  }
  0x9d   :  { %235 = dma.done.wait [#allocation4], 512  }
  0x9e   :  { %236 = vsyncadd [#allocation4], 4294966784 }
  0x9f   :  { %137 = vsyncpa [#allocation3], 1 }
  0xa0   :  { %138 = vsyncpa [#allocation6], 1 }
  0xa1   :  { %139 = vsyncpa [#allocation4], 1 }

</bundles_post_ra>
